<compile_context>
chip_gen: v7x
topology: tpu7x:2x2x1
jax: 0.10.0
libtpu: 0.0.40
codegen_flags: <defaults>
</compile_context>

<pallas_src>
import functools

import jax
import jax.numpy as jnp
from jax.experimental import pallas as pl
from jax.experimental.pallas import tpu as pltpu


def _round_up(n, m):
    return ((n + m - 1) // m) * m


def _pad2d(a, rows, cols):
    r, c = a.shape
    if r == rows and c == cols:
        return a
    return jnp.pad(a, ((0, rows - r), (0, cols - c)))


@functools.lru_cache(maxsize=1)
def _vmem_capacity_bytes():
    """Per-TensorCore VMEM capacity, generation-aware with safe fallbacks."""
    cap = None
    try:
        cap = int(pltpu.get_tpu_info().vmem_capacity_bytes)
    except Exception:
        cap = None
    try:
        kind = jax.devices()[0].device_kind.lower()
    except Exception:
        kind = ""
    if cap is None:
        if any(v in kind for v in ("v4", "v5", "v6")):
            cap = 128 * 1024 * 1024
        else:
            cap = 64 * 1024 * 1024          # conservative default (v7x per-TC)
    if "v7" in kind:                         # 64 MiB per TensorCore on v7x
        cap = min(cap, 64 * 1024 * 1024)
    return cap


def _vmem_need(tm, tf, dmp, x_isz, w_isz, n_w1, acc_in_scratch):
    """Working-set estimate incl. double buffers, f32 intermediates, scratch."""
    need = 2 * tm * dmp * x_isz                    # x tiles (double buffered)
    need += 2 * tm * dmp * x_isz                   # out tiles
    need += 2 * dmp * tf * w_isz * n_w1            # W1 (+Wv) tiles
    need += 2 * tf * dmp * w_isz                   # W2 tiles
    need += 2 * (tf * n_w1 + dmp) * w_isz          # bias tiles
    if acc_in_scratch:
        need += tm * dmp * 4                       # f32 accumulator scratch
    # f32 intermediates h (+v) and activated/gated g, plus downcast copy of g
    need += (n_w1 + 1) * tm * tf * 4 + tm * tf * w_isz
    return need


def _auto_tiles(M, dmp, dfp, x_isz, w_isz, n_w1, acc_in_scratch, budget, tm, tf):
    """Pick (tm, tf) for the per-core VMEM budget; auto-shrink until they fit."""
    big = budget >= 80 * 1024 * 1024          # 128 MiB parts vs 64 MiB (v7x)
    tf_target = 1024 if (big or n_w1 == 1) else 512
    tm_target = 1024 if big else 512

    # tf must be a 128-multiple that divides the padded d_ff (weights are only
    # padded to 128 once, outside the hot path).
    tf_divs = [d for d in range(128, dfp + 1, 128) if dfp % d == 0]
    tf_auto = tf is None
    if tf_auto:
        cands = [d for d in tf_divs if d <= tf_target]
        tf = cands[-1] if cands else tf_divs[0]
    else:
        assert tf % 128 == 0 and dfp % tf == 0, (
            "tf must be a multiple of 128 that divides the padded d_ff")

    tm_auto = tm is None
    tm_max = min(tm_target, _round_up(M, 8)) if tm_auto else tm
    assert tm_max % 8 == 0, "tm must be a multiple of 8"

    def need(tm_, tf_):
        return _vmem_need(tm_, tf_, dmp, x_isz, w_isz, n_w1, acc_in_scratch)

    # Auto-shrink instead of relying on a hard cap: shrink tf first (keeps the
    # row tile -- and thus weight arithmetic intensity -- high), then tm.
    while need(tm_max, tf) > budget:
        smaller = [d for d in tf_divs if d < tf]
        if tf_auto and smaller and tf > 256:
            tf = smaller[-1]
        elif tm_auto and tm_max > 128:
            tm_max = _round_up(max(128, tm_max // 2), 8)
        elif tf_auto and smaller:
            tf = smaller[-1]
        elif tm_auto and tm_max > 8:
            tm_max = _round_up(max(8, tm_max // 2), 8)
        else:
            break  # explicit tiles / minimum reached: honor the request

    if tm_auto:
        if M <= tm_max:
            tm, n_row = _round_up(M, 8), 1
        else:
            n_row = -(-M // tm_max)
            if n_row % 2:        # v7x megacore: keep the parallel axis even
                n_row += 1
            tm = _round_up(-(-M // n_row), 8)
    else:
        tm = tm_max
        n_row = -(-M // tm)
    return tm, tf, n_row, n_row * tm


def _ffn_kernel(x_ref, w1_ref, b1_ref, w2_ref, b2_ref, o_ref, *scratch):
    # f32 outputs accumulate directly into o_ref (its block index ignores k, so
    # it is resident across the reduction); bf16 outputs use the f32 scratch.
    acc_ref = scratch[0] if scratch else o_ref
    k = pl.program_id(1)

    @pl.when(k == 0)
    def _():
        acc_ref[...] = jnp.zeros_like(acc_ref)

    x = x_ref[...]
    h = jnp.dot(x, w1_ref[...], preferred_element_type=jnp.float32) + b1_ref[...]
    g = jnp.maximum(h, 0.0)                       # ReLU
    # dropout (eval mode) = identity
    acc_ref[...] += jnp.dot(g.astype(w2_ref.dtype), w2_ref[...],
                            preferred_element_type=jnp.float32)

    @pl.when(k == pl.num_programs(1) - 1)
    def _():
        o_ref[...] = (acc_ref[...] + b2_ref[...]).astype(o_ref.dtype)


def _ffn_kernel_gated(x_ref, w1_ref, b1_ref, wv_ref, bv_ref, w2_ref, b2_ref,
                      o_ref, *scratch):
    acc_ref = scratch[0] if scratch else o_ref
    k = pl.program_id(1)

    @pl.when(k == 0)
    def _():
        acc_ref[...] = jnp.zeros_like(acc_ref)

    x = x_ref[...]
    h = jnp.dot(x, w1_ref[...], preferred_element_type=jnp.float32) + b1_ref[...]
    g = jnp.maximum(h, 0.0)                       # ReLU
    v = jnp.dot(x, wv_ref[...], preferred_element_type=jnp.float32) + bv_ref[...]
    g = g * v
    # dropout (eval mode) = identity
    acc_ref[...] += jnp.dot(g.astype(w2_ref.dtype), w2_ref[...],
                            preferred_element_type=jnp.float32)

    @pl.when(k == pl.num_programs(1) - 1)
    def _():
        o_ref[...] = (acc_ref[...] + b2_ref[...]).astype(o_ref.dtype)


def prepare_params(params):
    """Pad weights/biases to lane-aligned shapes ONCE, outside the hot path.

    After this, every feed_forward call only pads x; the per-call HBM copy of
    the (potentially huge) weight matrices disappears.
    """
    d_model, d_ff = params["w1"].shape
    dmp, dfp = _round_up(d_model, 128), _round_up(d_ff, 128)
    out = dict(params)
    out["w1"] = _pad2d(params["w1"], dmp, dfp)
    out["b1"] = _pad2d(params["b1"], 1, dfp)
    out["w2"] = _pad2d(params["w2"], dfp, dmp)
    out["b2"] = _pad2d(params["b2"], 1, dmp)
    if "wv" in params:
        out["wv"] = _pad2d(params["wv"], dmp, dfp)
        out["bv"] = _pad2d(params["bv"], 1, dfp)
    return out


@functools.partial(jax.jit, static_argnames=("is_gated", "tm", "tf"))
def feed_forward(x, params, *, is_gated=False, tm=None, tf=None):
    """x: [B, S, d_model] -> [B, S, d_model].

    Fast path: pass bf16 x/params (kernel accumulates in f32 on the MXU) and
    pre-pad the weights once with prepare_params().
    """
    B, S, d_model = x.shape
    M = B * S
    dtype = x.dtype
    x_isz = jnp.dtype(dtype).itemsize
    w_isz = jnp.dtype(params["w1"].dtype).itemsize

    dmp = _round_up(d_model, 128)
    dfp = _round_up(params["w1"].shape[1], 128)
    n_w1 = 2 if is_gated else 1
    acc_in_out = jnp.dtype(dtype) == jnp.float32   # accumulate directly in o_ref

    cap = _vmem_capacity_bytes()
    budget = cap - max(8 << 20, cap // 8)          # headroom for Mosaic scratch

    tm, tf, n_row, Mp = _auto_tiles(M, dmp, dfp, x_isz, w_isz, n_w1,
                                    not acc_in_out, budget, tm, tf)

    # x is padded every call; the weight pads below are trace-time no-ops when
    # params were pre-padded with prepare_params().
    x2 = _pad2d(x.reshape(M, d_model), Mp, dmp)
    w1 = _pad2d(params["w1"], dmp, dfp)
    b1 = _pad2d(params["b1"], 1, dfp)
    w2 = _pad2d(params["w2"], dfp, dmp)
    b2 = _pad2d(params["b2"], 1, dmp)

    x_spec = pl.BlockSpec((tm, dmp), lambda i, k: (i, 0))
    w1_spec = pl.BlockSpec((dmp, tf), lambda i, k: (0, k))
    b1_spec = pl.BlockSpec((1, tf), lambda i, k: (0, k))
    w2_spec = pl.BlockSpec((tf, dmp), lambda i, k: (k, 0))
    b2_spec = pl.BlockSpec((1, dmp), lambda i, k: (0, 0))
    out_spec = pl.BlockSpec((tm, dmp), lambda i, k: (i, 0))

    if is_gated:
        kernel = _ffn_kernel_gated
        wv = _pad2d(params["wv"], dmp, dfp)
        bv = _pad2d(params["bv"], 1, dfp)
        in_specs = [x_spec, w1_spec, b1_spec, w1_spec, b1_spec, w2_spec, b2_spec]
        args = (x2, w1, b1, wv, bv, w2, b2)
    else:
        kernel = _ffn_kernel
        in_specs = [x_spec, w1_spec, b1_spec, w2_spec, b2_spec]
        args = (x2, w1, b1, w2, b2)

    # advisory cost estimate (for XLA scheduling around the custom call)
    d_ff = params["w1"].shape[1]
    flops = 2 * M * d_model * d_ff * (1 + n_w1)
    bytes_accessed = (x_isz * 2 * M * d_model
                      + w_isz * (d_model * d_ff * (n_w1 + 1) + d_ff * n_w1 + d_model))
    cost = pl.CostEstimate(flops=flops, transcendentals=0,
                           bytes_accessed=bytes_accessed)

    need = _vmem_need(tm, tf, dmp, x_isz, w_isz, n_w1, not acc_in_out)
    vmem_limit = int(min(max(budget, need + (16 << 20)), cap))

    scratch_shapes = [] if acc_in_out else [pltpu.VMEM((tm, dmp), jnp.float32)]

    out = pl.pallas_call(
        kernel,
        out_shape=jax.ShapeDtypeStruct((Mp, dmp), dtype),
        grid_spec=pltpu.PrefetchScalarGridSpec(
            num_scalar_prefetch=0,
            grid=(n_row, dfp // tf),
            in_specs=in_specs,
            out_specs=out_spec,
            scratch_shapes=scratch_shapes,
        ),
        compiler_params=pltpu.CompilerParams(
            dimension_semantics=("parallel", "arbitrary"),
            vmem_limit_bytes=vmem_limit),
        cost_estimate=cost,
    )(*args)

    return out[:M, :d_model].reshape(B, S, d_model)


def init_params(key, d_model, d_ff, is_gated=False, dtype=jnp.float32):
    """Deterministic parameter init (nn.Linear weights stored transposed as
    [d_in, d_out])."""
    k1, k2, k3 = jax.random.split(key, 3)
    scale1 = 1.0 / jnp.sqrt(d_model)
    scale2 = 1.0 / jnp.sqrt(d_ff)
    params = {
        "w1": (jax.random.normal(k1, (d_model, d_ff)) * scale1).astype(dtype),
        "b1": (jnp.zeros((1, d_ff)) + 0.01).astype(dtype),
        "w2": (jax.random.normal(k2, (d_ff, d_model)) * scale2).astype(dtype),
        "b2": (jnp.zeros((1, d_model)) - 0.01).astype(dtype),
    }
    if is_gated:
        params["wv"] = (jax.random.normal(k3, (d_model, d_ff)) * scale1).astype(dtype)
        params["bv"] = (jnp.zeros((1, d_ff)) + 0.02).astype(dtype)
    return params


def feed_forward_ref(x, params, *, is_gated=False):
    """Pure-JAX f32 reference for correctness checking."""
    xf = x.astype(jnp.float32)
    w1 = params["w1"].astype(jnp.float32)
    b1 = params["b1"].astype(jnp.float32)
    w2 = params["w2"].astype(jnp.float32)
    b2 = params["b2"].astype(jnp.float32)
    h = xf @ w1 + b1[0]
    g = jnp.maximum(h, 0.0)
    if is_gated:
        g = g * (xf @ params["wv"].astype(jnp.float32)
                 + params["bv"].astype(jnp.float32)[0])
    return g @ w2 + b2[0]


if __name__ == "__main__":
    key = jax.random.PRNGKey(0)
    kx, kp, kx2, kp2 = jax.random.split(key, 4)

    # ---- small shapes, f32, non-gated & gated (convenience unpadded path) ----
    B, S, d_model, d_ff = 2, 8, 32, 64
    x = jax.random.normal(kx, (B, S, d_model), jnp.float32)

    params = init_params(kp, d_model, d_ff, is_gated=False)
    y = feed_forward(x, params, is_gated=False)
    jax.block_until_ready(y)
    assert y.shape == (B, S, d_model)
    assert jnp.allclose(y, feed_forward_ref(x, params, is_gated=False),
                        atol=1e-5, rtol=1e-5)

    params_g = init_params(kp, d_model, d_ff, is_gated=True)
    yg = feed_forward(x, params_g, is_gated=True)
    jax.block_until_ready(yg)
    assert jnp.allclose(yg, feed_forward_ref(x, params_g, is_gated=True),
                        atol=1e-5, rtol=1e-5)

    # ---- moderate, non-128-aligned dims: pre-padded weights, multi-tile grid
    #      (4 row tiles x 4 d_ff tiles), f32 -> accumulate directly in o_ref ----
    B2, S2, d_model2, d_ff2 = 2, 256, 320, 1000
    x2 = jax.random.normal(kx2, (B2, S2, d_model2), jnp.float32)
    params2 = init_params(kp2, d_model2, d_ff2, is_gated=True)
    params2_prep = prepare_params(params2)          # pad weights once, off the hot path
    y2 = feed_forward(x2, params2_prep, is_gated=True, tm=128, tf=256)
    jax.block_until_ready(y2)
    assert jnp.allclose(y2, feed_forward_ref(x2, params2, is_gated=True),
                        atol=1e-3, rtol=1e-3)

    # ---- bf16 MXU fast path (f32 scratch accumulator, k accumulation) ----
    xb = x2.astype(jnp.bfloat16)
    params_b = {k: v.astype(jnp.bfloat16) for k, v in params2.items()}
    params_b_prep = prepare_params(params_b)
    yb = feed_forward(xb, params_b_prep, is_gated=True, tf=256)
    jax.block_until_ready(yb)
    assert jnp.allclose(yb.astype(jnp.float32),
                        feed_forward_ref(xb, params_b, is_gated=True),
                        atol=1e-1, rtol=1e-1)

    print("KERNEL_OK")
</pallas_src>

<mosaic_0001>
module attributes {stable_mosaic.version = 11 : i64} {
  func.func @_ffn_kernel(%arg0: i32, %arg1: i32, %arg2: memref<16x128xf32, #tpu.memory_space<vmem>>, %arg3: memref<128x128xf32, #tpu.memory_space<vmem>>, %arg4: memref<1x128xf32, #tpu.memory_space<vmem>>, %arg5: memref<128x128xf32, #tpu.memory_space<vmem>>, %arg6: memref<1x128xf32, #tpu.memory_space<vmem>>, %arg7: memref<16x128xf32, #tpu.memory_space<vmem>>) attributes {dimension_semantics = [#tpu.dimension_semantics<parallel>, #tpu.dimension_semantics<arbitrary>], iteration_bounds = array<i64: 1, 1>, scalar_prefetch = 0 : i64, scratch_operands = 0 : i64, tpu.core_type = #tpu.core_type<tc>, window_params = [{transform_indices = @transform_0, window_bounds = array<i64: 16, 128>}, {transform_indices = @transform_1, window_bounds = array<i64: 128, 128>}, {transform_indices = @transform_2, window_bounds = array<i64: 1, 128>}, {transform_indices = @transform_3, window_bounds = array<i64: 128, 128>}, {pipeline_mode = #tpu.pipeline_mode<synchronous>, transform_indices = @transform_4, window_bounds = array<i64: 1, 128>}, {transform_indices = @transform_5, window_bounds = array<i64: 16, 128>}]} {
    %c0_i32 = arith.constant 0 : i32
    %0 = arith.cmpi eq, %arg1, %c0_i32 : i32
    %1 = arith.extui %0 : i1 to i32
    %c0_i32_0 = arith.constant 0 : i32
    %2 = arith.cmpi ne, %1, %c0_i32_0 : i32
    scf.if %2 {
      %cst_16 = arith.constant 0.000000e+00 : f32
      %19 = vector.broadcast %cst_16 : f32 to vector<16x128xf32>
      %c0_17 = arith.constant 0 : index
      %c0_18 = arith.constant 0 : index
      %20 = vector.load %arg7[%c0_17, %c0_18] : memref<16x128xf32, #tpu.memory_space<vmem>>, vector<16x128xf32>
      tpu.vector_store %arg7[%c0_17, %c0_18], %19 {strides = array<i32>} : memref<16x128xf32, #tpu.memory_space<vmem>>, vector<16x128xf32>,
    } else {
    }
    %c0 = arith.constant 0 : index
    %c0_1 = arith.constant 0 : index
    %3 = vector.load %arg2[%c0, %c0_1] : memref<16x128xf32, #tpu.memory_space<vmem>>, vector<16x128xf32>
    %c0_2 = arith.constant 0 : index
    %c0_3 = arith.constant 0 : index
    %4 = vector.load %arg3[%c0_2, %c0_3] : memref<128x128xf32, #tpu.memory_space<vmem>>, vector<128x128xf32>
    %cst = arith.constant dense<0.000000e+00> : vector<16x128xf32>
    %5 = tpu.matmul %3, %4, %cst {dimension_numbers = #tpu.dot_dimension_numbers<[1], [0], [0], [1], [0, 0, 1, 1], [], []>} : vector<16x128xf32>, vector<128x128xf32>, vector<16x128xf32> -> vector<16x128xf32>
    %c0_4 = arith.constant 0 : index
    %c0_5 = arith.constant 0 : index
    %6 = vector.load %arg4[%c0_4, %c0_5] : memref<1x128xf32, #tpu.memory_space<vmem>>, vector<1x128xf32>
    %7 = vector.broadcast %6 : vector<1x128xf32> to vector<16x128xf32>
    %8 = arith.addf %5, %7 : vector<16x128xf32>
    %cst_6 = arith.constant 0.000000e+00 : f32
    %9 = vector.broadcast %cst_6 : f32 to vector<16x128xf32>
    %10 = arith.maximumf %8, %9 : vector<16x128xf32>
    %c0_7 = arith.constant 0 : index
    %c0_8 = arith.constant 0 : index
    %11 = vector.load %arg7[%c0_7, %c0_8] : memref<16x128xf32, #tpu.memory_space<vmem>>, vector<16x128xf32>
    %c0_9 = arith.constant 0 : index
    %c0_10 = arith.constant 0 : index
    %12 = vector.load %arg5[%c0_9, %c0_10] : memref<128x128xf32, #tpu.memory_space<vmem>>, vector<128x128xf32>
    %cst_11 = arith.constant dense<0.000000e+00> : vector<16x128xf32>
    %13 = tpu.matmul %10, %12, %cst_11 {dimension_numbers = #tpu.dot_dimension_numbers<[1], [0], [0], [1], [0, 0, 1, 1], [], []>} : vector<16x128xf32>, vector<128x128xf32>, vector<16x128xf32> -> vector<16x128xf32>
    %14 = arith.addf %11, %13 : vector<16x128xf32>
    %c0_12 = arith.constant 0 : index
    %c0_13 = arith.constant 0 : index
    %15 = vector.load %arg7[%c0_12, %c0_13] : memref<16x128xf32, #tpu.memory_space<vmem>>, vector<16x128xf32>
    tpu.vector_store %arg7[%c0_12, %c0_13], %14 {strides = array<i32>} : memref<16x128xf32, #tpu.memory_space<vmem>>, vector<16x128xf32>,
    %c0_i32_14 = arith.constant 0 : i32
    %16 = arith.cmpi eq, %arg1, %c0_i32_14 : i32
    %17 = arith.extui %16 : i1 to i32
    %c0_i32_15 = arith.constant 0 : i32
    %18 = arith.cmpi ne, %17, %c0_i32_15 : i32
    scf.if %18 {
      %c0_16 = arith.constant 0 : index
      %c0_17 = arith.constant 0 : index
      %19 = vector.load %arg7[%c0_16, %c0_17] : memref<16x128xf32, #tpu.memory_space<vmem>>, vector<16x128xf32>
      %c0_18 = arith.constant 0 : index
      %c0_19 = arith.constant 0 : index
      %20 = vector.load %arg6[%c0_18, %c0_19] : memref<1x128xf32, #tpu.memory_space<vmem>>, vector<1x128xf32>
      %21 = vector.broadcast %20 : vector<1x128xf32> to vector<16x128xf32>
      %22 = arith.addf %19, %21 : vector<16x128xf32>
      %c0_20 = arith.constant 0 : index
      %c0_21 = arith.constant 0 : index
      %23 = vector.load %arg7[%c0_20, %c0_21] : memref<16x128xf32, #tpu.memory_space<vmem>>, vector<16x128xf32>
      tpu.vector_store %arg7[%c0_20, %c0_21], %22 {strides = array<i32>} : memref<16x128xf32, #tpu.memory_space<vmem>>, vector<16x128xf32>,
    } else {
    }
    return
  }
  func.func @transform_0(%arg0: i32, %arg1: i32) -> (i32, i32) {
    %c0_i32 = arith.constant 0 : i32
    %c0_i32_0 = arith.constant 0 : i32
    return %arg0, %c0_i32 : i32, i32
  }
  func.func @transform_1(%arg0: i32, %arg1: i32) -> (i32, i32) {
    %c0_i32 = arith.constant 0 : i32
    %c0_i32_0 = arith.constant 0 : i32
    return %c0_i32, %arg1 : i32, i32
  }
  func.func @transform_2(%arg0: i32, %arg1: i32) -> (i32, i32) {
    %c0_i32 = arith.constant 0 : i32
    %c0_i32_0 = arith.constant 0 : i32
    return %c0_i32, %arg1 : i32, i32
  }
  func.func @transform_3(%arg0: i32, %arg1: i32) -> (i32, i32) {
    %c0_i32 = arith.constant 0 : i32
    %c0_i32_0 = arith.constant 0 : i32
    return %arg1, %c0_i32 : i32, i32
  }
  func.func @transform_4(%arg0: i32, %arg1: i32) -> (i32, i32) {
    %c0_i32 = arith.constant 0 : i32
    %c0_i32_0 = arith.constant 0 : i32
    %c0_i32_1 = arith.constant 0 : i32
    return %c0_i32, %c0_i32_0 : i32, i32
  }
  func.func @transform_5(%arg0: i32, %arg1: i32) -> (i32, i32) {
    %c0_i32 = arith.constant 0 : i32
    %c0_i32_0 = arith.constant 0 : i32
    return %arg0, %c0_i32 : i32, i32
  }
}

</mosaic_0001>

<bundles_post_ra>
// kernel: feed_forward.1
= control target key start
LH: loop header
LB: loop body
LE: loop exit
PB: predicated region body
PF: predicated region fallthrough
CT: control target
= control target key end

     0   :  { %s562_s1 = inlined_call_operand.vmem [shape: f32[128,128], index: 1, kind: input, shape index: {}]   ;;  %s563_s0 = inlined_call_operand.vmem [shape: f32[16,128], index: 0, kind: input, shape index: {}]   ;;  %s564_s3 = inlined_call_operand.vmem [shape: f32[128,128], index: 3, kind: input, shape index: {}]   ;;  %s565_s2 = inlined_call_operand.vmem [shape: f32[1,128], index: 2, kind: input, shape index: {}]   ;;  %s566_s4 = inlined_call_operand.vmem [shape: f32[1,128], index: 4, kind: input, shape index: {}]   ;;  %s567_s5 = inlined_call_operand.vmem [shape: f32[16,128], index: 5, kind: output, shape index: {}]  }
   0x1   :  { %v28_v0 = vld [vmem:[%s562_s1] sm:$0xff]  ;;  %v29_v1 = vld [vmem:[%s562_s1 + $0x8] sm:$0xff]  ;;  %v30_v2 = vld [vmem:[%s562_s1 + $0x10] sm:$0xff] }
   0x2   :  { %v353_v3 = vpack.c.bf16 %v29_v1, %v28_v0  ;;  %v31_v4 = vld [vmem:[%s562_s1 + $0x18] sm:$0xff]  ;;  %v32_v6 = vld [vmem:[%s562_s1 + $0x20] sm:$0xff]  ;;  %v33_v7 = vld [vmem:[%s562_s1 + $0x28] sm:$0xff] }
   0x3   :  { %v357_v5 = vpack.c.bf16 %v31_v4, %v30_v2  ;;  %v361_v8 = vpack.c.bf16 %v33_v7, %v32_v6  ;;  %v34_v9 = vld [vmem:[%s562_s1 + $0x30] sm:$0xff]  ;;  %v35_v10 = vld [vmem:[%s562_s1 + $0x38] sm:$0xff]  ;;  %v26_v11 = vld [vmem:[%s563_s0] sm:$0xff] }
   0x4   :  { %354 = vmatprep.subr.bf16.mxu0 %v353_v3  ;;  %315 = vmatprep.mubr.f32.mxu0 %v26_v11  ;;  %v130_v12 = vld [vmem:[%s564_s3] sm:$0xff]  ;;  %v131_v13 = vld [vmem:[%s564_s3 + $0x8] sm:$0xff]  ;;  %v132_v14 = vld [vmem:[%s564_s3 + $0x10] sm:$0xff]  ;;  %v365_v20 = vpack.c.bf16 %v35_v10, %v34_v9 }
   0x5   :  { %356 = vmatpush3.bf16.msra.mxu0 %v353_v3  ;;  %v385_v15 = vpack.c.bf16 %v131_v13, %v130_v12  ;;  %v133_v16 = vld [vmem:[%s564_s3 + $0x18] sm:$0xff]  ;;  %v134_v18 = vld [vmem:[%s564_s3 + $0x20] sm:$0xff]  ;;  %v135_v19 = vld [vmem:[%s564_s3 + $0x28] sm:$0xff] }
   0x6   :  { %358 = vmatprep.subr.bf16.mxu0 %v357_v5  ;;  %v389_v17 = vpack.c.bf16 %v133_v16, %v132_v14  ;;  %v36_v21 = vld [vmem:[%s562_s1 + $0x40] sm:$0xff]  ;;  %v37_v22 = vld [vmem:[%s562_s1 + $0x48] sm:$0xff]  ;;  %v393_v23 = vpack.c.bf16 %v135_v19, %v134_v18  ;;  %v136_v24 = vld [vmem:[%s564_s3 + $0x30] sm:$0xff] }
   0x7   :  { %386 = vmatprep.subr.bf16.mxu1 %v385_v15  ;;  %v137_v25 = vld [vmem:[%s564_s3 + $0x38] sm:$0xff]  ;;  %v369_v26 = vpack.c.bf16 %v37_v22, %v36_v21  ;;  %v38_v27 = vld [vmem:[%s562_s1 + $0x50] sm:$0xff]  ;;  %v138_v30 = vld [vmem:[%s564_s3 + $0x40] sm:$0xff] }
   0x8   :  { %388 = vmatpush3.bf16.msra.mxu1 %v385_v15  ;;  %v39_v28 = vld [vmem:[%s562_s1 + $0x58] sm:$0xff]  ;;  %v397_v29 = vpack.c.bf16 %v137_v25, %v136_v24  ;;  %v139_v31 = vld [vmem:[%s564_s3 + $0x48] sm:$0xff]  ;;  %v40_v33 = vld [vmem:[%s562_s1 + $0x60] sm:$0xff] }
   0x9   :  { %360 = vmatpush3.bf16.msra.mxu0 %v357_v5  ;;  %390 = vmatprep.subr.bf16.mxu1 %v389_v17  ;;  %v373_v32 = vpack.c.bf16 %v39_v28, %v38_v27  ;;  %v41_v34 = vld [vmem:[%s562_s1 + $0x68] sm:$0xff]  ;;  %v401_v35 = vpack.c.bf16 %v139_v31, %v138_v30  ;;  %v140_v36 = vld [vmem:[%s564_s3 + $0x50] sm:$0xff]  ;;  %v141_v37 = vld [vmem:[%s564_s3 + $0x58] sm:$0xff] }
   0xa   :  { %362 = vmatprep.subr.bf16.mxu0 %v361_v8  ;;  %v377_v38 = vpack.c.bf16 %v41_v34, %v40_v33  ;;  %v42_v39 = vld [vmem:[%s562_s1 + $0x70] sm:$0xff]  ;;  %v43_v40 = vld [vmem:[%s562_s1 + $0x78] sm:$0xff]  ;;  %v405_v41 = vpack.c.bf16 %v141_v37, %v140_v36  ;;  %v142_v42 = vld [vmem:[%s564_s3 + $0x60] sm:$0xff] }
   0xb   :  { %v143_v43 = vld [vmem:[%s564_s3 + $0x68] sm:$0xff]  ;;  %v381_v44 = vpack.c.bf16 %v43_v40, %v42_v39  ;;  %v144_v47 = vld [vmem:[%s564_s3 + $0x70] sm:$0xff]  ;;  %v145_v48 = vld [vmem:[%s564_s3 + $0x78] sm:$0xff] }
   0xc   :  { %392 = vmatpush3.bf16.msra.mxu1 %v389_v17  ;;  %v409_v45 = vpack.c.bf16 %v143_v43, %v142_v42  ;;  %v27_v46 = vld [vmem:[%s563_s0 + $0x8] sm:$0xff]  ;;  %v413_v49 = vpack.c.bf16 %v145_v48, %v144_v47  ;;  %v245_v50 = vld [vmem:[%s565_s2] ss:$0 sm:$0xff] }
   0xd   :  { %364 = vmatpush3.bf16.msra.mxu0 %v361_v8  ;;  %394 = vmatprep.subr.bf16.mxu1 %v393_v23  ;;  %v246_v58 = vld [vmem:[%s566_s4] ss:$0 sm:$0xff] }
   0xe   :  { %366 = vmatprep.subr.bf16.mxu0 %v365_v20 }
  0x10   :  { %396 = vmatpush3.bf16.msra.mxu1 %v393_v23 }
  0x11   :  { %368 = vmatpush3.bf16.msra.mxu0 %v365_v20  ;;  %398 = vmatprep.subr.bf16.mxu1 %v397_v29 }
  0x12   :  { %370 = vmatprep.subr.bf16.mxu0 %v369_v26 }
  0x14   :  { %400 = vmatpush3.bf16.msra.mxu1 %v397_v29 }
  0x15   :  { %372 = vmatpush3.bf16.msra.mxu0 %v369_v26  ;;  %402 = vmatprep.subr.bf16.mxu1 %v401_v35 }
  0x16   :  { %374 = vmatprep.subr.bf16.mxu0 %v373_v32 }
  0x18   :  { %404 = vmatpush3.bf16.msra.mxu1 %v401_v35 }
  0x19   :  { %376 = vmatpush3.bf16.msra.mxu0 %v373_v32  ;;  %406 = vmatprep.subr.bf16.mxu1 %v405_v41 }
  0x1a   :  { %378 = vmatprep.subr.bf16.mxu0 %v377_v38 }
  0x1c   :  { %408 = vmatpush3.bf16.msra.mxu1 %v405_v41 }
  0x1d   :  { %380 = vmatpush3.bf16.msra.mxu0 %v377_v38  ;;  %410 = vmatprep.subr.bf16.mxu1 %v409_v45 }
  0x1e   :  { %382 = vmatprep.subr.bf16.mxu0 %v381_v44 }
  0x20   :  { %412 = vmatpush3.bf16.msra.mxu1 %v409_v45 }
  0x21   :  { %384 = vmatpush3.bf16.msra.mxu0 %v381_v44  ;;  %414 = vmatprep.subr.bf16.mxu1 %v413_v49 }
  0x24   :  { %316 = vmatmul.mubr.f32.vlgmr.msra.gmra.mrb[0].mxu0 %v27_v46  ;;  %416 = vmatpush3.bf16.msra.mxu1 %v413_v49 }
  0xf7   :  { %v317_v51 = vpop.f32.mrb[0].mxu0 }
  0xf8   :  { %v123_v52 = vadd.f32 %v317_v51, %v245_v50  ;;  %v117_v53 = vpop.f32.mrb[1].mxu0 }
  0xf9   :  { %v118_v54 = vadd.f32 %v245_v50, %v117_v53 }
  0xfa   :  { %v127_v56 = vmax.f32 %v123_v52, 0.0 }
  0xfb   :  { %v126_v55 = vmax.f32 %v118_v54, 0.0 }
  0xfd   :  { %350 = vmatprep.mubr.f32.mxu1 %v126_v55 }
  0xfe   :  { %351 = vmatmul.mubr.f32.vlgmr.msra.gmra.mrb[0].mxu1 %v127_v56 }
 0x1d1   :  { %v352_v57 = vpop.f32.mrb[0].mxu1 }
 0x1d2   :  { %v212_v59 = vpop.f32.mrb[1].mxu1  ;;  %v238_v60 = vadd.f32 %v352_v57, %v246_v58 }
 0x1d3   :  { %v237_v61 = vadd.f32 %v246_v58, %v212_v59 }
 0x1d4   :  { %240 = vst [vmem:[%s567_s5 + $0x8] sm:$0xff] %v238_v60 }
 0x1d5   :  { %239 = vst [vmem:[%s567_s5] sm:$0xff] %v237_v61 }

</bundles_post_ra>
